<compile_context>
chip_gen: v5e
topology: v5e:2x2
jax: 0.10.0
libtpu: 0.0.40
codegen_flags: <defaults>
</compile_context>

<pallas_src>
import jax
import jax.numpy as jnp
from jax.experimental import pallas as pl
from jax.experimental.pallas import tpu as pltpu

LANE = 128     # vreg lane width
SUBLANE = 8    # vreg sublane count (f32)
K_ALIGN = 16   # bf16 sublane packing for w1's leading (contraction) dim


def _round_up(n, m):
    return ((n + m - 1) // m) * m


def _actor_kernel(amax_ref, x_ref, w1_ref, b1_ref, w2_ref, b2_ref,
                  w3_ref, b3_ref, o_ref):
    # bf16 x bf16 -> f32-accumulated MXU matmul.
    def mxu(a_bf16, w_ref):
        return jnp.dot(a_bf16, w_ref[...], preferred_element_type=jnp.float32)

    # Carry activations in bf16 between layers: identical math to casting inside
    # the matmul, but halves the live intermediate footprint (fewer vreg spills).
    x = x_ref[...].astype(jnp.bfloat16)                          # (TB, s_pad)

    # Layer 1: Linear(s_pad -> 512pad) + ReLU
    h1 = jnp.maximum(mxu(x, w1_ref) + b1_ref[...], 0.0)
    h1 = h1.astype(jnp.bfloat16)                                 # (TB, 512) bf16

    # Layer 2: Linear(512pad -> 384pad) + ReLU
    h2 = jnp.maximum(mxu(h1, w2_ref) + b2_ref[...], 0.0)
    h2 = h2.astype(jnp.bfloat16)                                 # (TB, 384) bf16

    # Layer 3: Linear(384pad -> 128pad), then a_max * tanh (EUP slot)
    h3 = mxu(h2, w3_ref) + b3_ref[...]                           # (TB, 128) f32
    o_ref[...] = (amax_ref[0] * jnp.tanh(h3)).astype(o_ref.dtype)


def actor_forward(x, params, max_action, *, block_batch=512):
    """x: (batch, s_dim) f32. params: padded bf16 weights / f32 row biases.

    block_batch: batch rows per grid step (use up to 1024 for very large batches).
    """
    w1, b1 = params["w1"], params["b1"]     # (s_pad, 512) bf16, (1, 512) f32
    w2, b2 = params["w2"], params["b2"]     # (512, 384)   bf16, (1, 384) f32
    w3, b3 = params["w3"], params["b3"]     # (384, 128)   bf16, (1, 128) f32
    a_dim = params["a_dim"]

    batch, s_dim = x.shape
    s_pad = w1.shape[0]
    assert s_pad >= s_dim
    h1p, h2p, a_pad = w1.shape[1], w2.shape[1], w3.shape[1]

    # Pad x's feature dim to match w1's padded K (exact zeros, no value change);
    # only pad rows when batch < one sublane tile (trivial copy). Large batches
    # are NOT copied: the grid uses cdiv and Pallas masks the ragged last block.
    pad_rows = SUBLANE - batch if batch < SUBLANE else 0
    pad_cols = s_pad - s_dim
    if pad_rows or pad_cols:
        x = jnp.pad(x, ((0, pad_rows), (0, pad_cols)))
    rows = x.shape[0]

    # Batch tile: big (amortizes per-grid-step overhead), sublane-aligned.
    tb = _round_up(min(block_batch, _round_up(rows, SUBLANE)), SUBLANE)
    grid = (pl.cdiv(rows, tb),)

    amax = jnp.full((1,), max_action, dtype=jnp.float32)

    out = pl.pallas_call(
        _actor_kernel,
        out_shape=jax.ShapeDtypeStruct((rows, a_pad), jnp.float32),
        grid=grid,
        in_specs=[
            # a_max scalar lives in SMEM (no recompile when it changes).
            pl.BlockSpec(memory_space=pltpu.MemorySpace.SMEM),
            # Activations: tiled along batch, pipelined across grid steps.
            pl.BlockSpec((tb, s_pad), lambda i: (i, 0)),
            # Weights / biases: same block every step -> VMEM-resident.
            pl.BlockSpec((s_pad, h1p), lambda i: (0, 0)),
            pl.BlockSpec((1, h1p), lambda i: (0, 0)),
            pl.BlockSpec((h1p, h2p), lambda i: (0, 0)),
            pl.BlockSpec((1, h2p), lambda i: (0, 0)),
            pl.BlockSpec((h2p, a_pad), lambda i: (0, 0)),
            pl.BlockSpec((1, a_pad), lambda i: (0, 0)),
        ],
        out_specs=pl.BlockSpec((tb, a_pad), lambda i: (i, 0)),
        compiler_params=pltpu.CompilerParams(
            # TODO(synk): on v7x, verify the batch grid is actually split across
            # both TensorCores; if profiling shows single-TC execution, switch
            # this axis to pltpu.CORE_PARALLEL (or an explicit core_map split).
            dimension_semantics=("parallel",),
        ),
    )(amax, x, w1, b1, w2, b2, w3, b3)

    # Drop any row padding and the lane-padded action columns.
    return out[:batch, :a_dim]


def init_actor_params(key, s_dim, a_dim):
    """torch.nn.Linear-style init (U(-1/sqrt(fan_in), +)), then zero-pad to
    TPU-friendly widths and store weights in bf16 (biases stay f32)."""
    h1, h2 = 400, 300
    s_pad = _round_up(s_dim, K_ALIGN)                     # bf16 sublane-clean K
    h1p, h2p = _round_up(h1, LANE), _round_up(h2, LANE)   # 512, 384
    a_pad = _round_up(a_dim, LANE)                        # 128

    def linear(key, fan_in, fan_out, pad_in, pad_out):
        kw, kb = jax.random.split(key)
        bound = 1.0 / jnp.sqrt(jnp.float32(fan_in))
        w = jax.random.uniform(kw, (fan_in, fan_out), jnp.float32, -bound, bound)
        b = jax.random.uniform(kb, (1, fan_out), jnp.float32, -bound, bound)
        w = jnp.pad(w, ((0, pad_in - fan_in), (0, pad_out - fan_out)))
        b = jnp.pad(b, ((0, 0), (0, pad_out - fan_out)))
        return w.astype(jnp.bfloat16), b

    k1, k2, k3 = jax.random.split(key, 3)
    w1, b1 = linear(k1, s_dim, h1, s_pad, h1p)
    w2, b2 = linear(k2, h1, h2, h1p, h2p)
    w3, b3 = linear(k3, h2, a_dim, h2p, a_pad)
    return {"w1": w1, "b1": b1, "w2": w2, "b2": b2, "w3": w3, "b3": b3,
            "a_dim": a_dim}


def actor_reference(x, params, max_action):
    """Pure-JAX reference using the same bf16-weight / f32-accumulate math."""
    s_pad = params["w1"].shape[0]
    if s_pad != x.shape[1]:
        x = jnp.pad(x, ((0, 0), (0, s_pad - x.shape[1])))

    def mm(a, w):
        return jnp.dot(a.astype(jnp.bfloat16), w,
                       preferred_element_type=jnp.float32)

    h = jnp.maximum(mm(x, params["w1"]) + params["b1"], 0.0)
    h = jnp.maximum(mm(h, params["w2"]) + params["b2"], 0.0)
    out = max_action * jnp.tanh(mm(h, params["w3"]) + params["b3"])
    return out[:, :params["a_dim"]]


if __name__ == "__main__":
    key = jax.random.PRNGKey(0)
    k_params, k_x = jax.random.split(key)

    batch, s_dim, a_dim, a_max = 2, 16, 4, 2.0

    params = init_actor_params(k_params, s_dim, a_dim)
    x = jax.random.normal(k_x, (batch, s_dim), jnp.float32)

    out = actor_forward(x, params, a_max)
    out = jax.block_until_ready(out)

    ref = actor_reference(x, params, a_max)
    assert out.shape == (batch, a_dim)
    assert jnp.allclose(out, ref, atol=2e-3, rtol=2e-3), "mismatch vs reference"

    print("KERNEL_OK")
</pallas_src>

<mosaic_0001>
module attributes {stable_mosaic.version = 11 : i64} {
  func.func @_actor_kernel(%arg0: i32, %arg1: memref<1xf32, #tpu.memory_space<smem>>, %arg2: memref<8x16xf32, #tpu.memory_space<vmem>>, %arg3: memref<16x512xbf16, #tpu.memory_space<vmem>>, %arg4: memref<1x512xf32, #tpu.memory_space<vmem>>, %arg5: memref<512x384xbf16, #tpu.memory_space<vmem>>, %arg6: memref<1x384xf32, #tpu.memory_space<vmem>>, %arg7: memref<384x128xbf16, #tpu.memory_space<vmem>>, %arg8: memref<1x128xf32, #tpu.memory_space<vmem>>, %arg9: memref<8x128xf32, #tpu.memory_space<vmem>>) attributes {dimension_semantics = [#tpu.dimension_semantics<parallel>], iteration_bounds = array<i64: 1>, scalar_prefetch = 0 : i64, scratch_operands = 0 : i64, tpu.core_type = #tpu.core_type<tc>, window_params = [{transform_indices = @transform_0, window_bounds = array<i64: 1>}, {transform_indices = @transform_1, window_bounds = array<i64: 8, 16>}, {pipeline_mode = #tpu.pipeline_mode<synchronous>, transform_indices = @transform_2, window_bounds = array<i64: 16, 512>}, {pipeline_mode = #tpu.pipeline_mode<synchronous>, transform_indices = @transform_3, window_bounds = array<i64: 1, 512>}, {pipeline_mode = #tpu.pipeline_mode<synchronous>, transform_indices = @transform_4, window_bounds = array<i64: 512, 384>}, {pipeline_mode = #tpu.pipeline_mode<synchronous>, transform_indices = @transform_5, window_bounds = array<i64: 1, 384>}, {pipeline_mode = #tpu.pipeline_mode<synchronous>, transform_indices = @transform_6, window_bounds = array<i64: 384, 128>}, {pipeline_mode = #tpu.pipeline_mode<synchronous>, transform_indices = @transform_7, window_bounds = array<i64: 1, 128>}, {transform_indices = @transform_8, window_bounds = array<i64: 8, 128>}]} {
    %c0 = arith.constant 0 : index
    %c0_0 = arith.constant 0 : index
    %0 = vector.load %arg2[%c0, %c0_0] : memref<8x16xf32, #tpu.memory_space<vmem>>, vector<8x16xf32>
    %1 = arith.truncf %0 : vector<8x16xf32> to vector<8x16xbf16>
    %c0_1 = arith.constant 0 : index
    %c0_2 = arith.constant 0 : index
    %2 = vector.load %arg3[%c0_1, %c0_2] : memref<16x512xbf16, #tpu.memory_space<vmem>>, vector<16x512xbf16>
    %cst = arith.constant dense<0.000000e+00> : vector<8x512xf32>
    %3 = tpu.matmul %1, %2, %cst {dimension_numbers = #tpu.dot_dimension_numbers<[1], [0], [0], [1], [0, 0, 1, 1], [], []>} : vector<8x16xbf16>, vector<16x512xbf16>, vector<8x512xf32> -> vector<8x512xf32>
    %c0_3 = arith.constant 0 : index
    %c0_4 = arith.constant 0 : index
    %4 = vector.load %arg4[%c0_3, %c0_4] : memref<1x512xf32, #tpu.memory_space<vmem>>, vector<1x512xf32>
    %5 = vector.broadcast %4 : vector<1x512xf32> to vector<8x512xf32>
    %6 = arith.addf %3, %5 : vector<8x512xf32>
    %cst_5 = arith.constant 0.000000e+00 : f32
    %7 = vector.broadcast %cst_5 : f32 to vector<8x512xf32>
    %8 = arith.maximumf %6, %7 : vector<8x512xf32>
    %9 = arith.truncf %8 : vector<8x512xf32> to vector<8x512xbf16>
    %c0_6 = arith.constant 0 : index
    %c0_7 = arith.constant 0 : index
    %10 = vector.load %arg5[%c0_6, %c0_7] : memref<512x384xbf16, #tpu.memory_space<vmem>>, vector<512x384xbf16>
    %cst_8 = arith.constant dense<0.000000e+00> : vector<8x384xf32>
    %11 = tpu.matmul %9, %10, %cst_8 {dimension_numbers = #tpu.dot_dimension_numbers<[1], [0], [0], [1], [0, 0, 1, 1], [], []>} : vector<8x512xbf16>, vector<512x384xbf16>, vector<8x384xf32> -> vector<8x384xf32>
    %c0_9 = arith.constant 0 : index
    %c0_10 = arith.constant 0 : index
    %12 = vector.load %arg6[%c0_9, %c0_10] : memref<1x384xf32, #tpu.memory_space<vmem>>, vector<1x384xf32>
    %13 = vector.broadcast %12 : vector<1x384xf32> to vector<8x384xf32>
    %14 = arith.addf %11, %13 : vector<8x384xf32>
    %cst_11 = arith.constant 0.000000e+00 : f32
    %15 = vector.broadcast %cst_11 : f32 to vector<8x384xf32>
    %16 = arith.maximumf %14, %15 : vector<8x384xf32>
    %17 = arith.truncf %16 : vector<8x384xf32> to vector<8x384xbf16>
    %c0_12 = arith.constant 0 : index
    %c0_13 = arith.constant 0 : index
    %18 = vector.load %arg7[%c0_12, %c0_13] : memref<384x128xbf16, #tpu.memory_space<vmem>>, vector<384x128xbf16>
    %cst_14 = arith.constant dense<0.000000e+00> : vector<8x128xf32>
    %19 = tpu.matmul %17, %18, %cst_14 {dimension_numbers = #tpu.dot_dimension_numbers<[1], [0], [0], [1], [0, 0, 1, 1], [], []>} : vector<8x384xbf16>, vector<384x128xbf16>, vector<8x128xf32> -> vector<8x128xf32>
    %c0_15 = arith.constant 0 : index
    %c0_16 = arith.constant 0 : index
    %20 = vector.load %arg8[%c0_15, %c0_16] : memref<1x128xf32, #tpu.memory_space<vmem>>, vector<1x128xf32>
    %21 = vector.broadcast %20 : vector<1x128xf32> to vector<8x128xf32>
    %22 = arith.addf %19, %21 : vector<8x128xf32>
    %c0_17 = arith.constant 0 : index
    %23 = memref.load %arg1[%c0_17] : memref<1xf32, #tpu.memory_space<smem>>
    %24 = math.tanh %22 : vector<8x128xf32>
    %25 = vector.broadcast %23 : f32 to vector<8x128xf32>
    %26 = arith.mulf %25, %24 : vector<8x128xf32>
    %c0_18 = arith.constant 0 : index
    %c0_19 = arith.constant 0 : index
    %27 = vector.load %arg9[%c0_18, %c0_19] : memref<8x128xf32, #tpu.memory_space<vmem>>, vector<8x128xf32>
    tpu.vector_store %arg9[%c0_18, %c0_19], %26 {strides = array<i32>} : memref<8x128xf32, #tpu.memory_space<vmem>>, vector<8x128xf32>,
    return
  }
  func.func @transform_0(%arg0: i32) -> i32 {
    %c0_i32 = arith.constant 0 : i32
    %c0_i32_0 = arith.constant 0 : i32
    return %c0_i32 : i32
  }
  func.func @transform_1(%arg0: i32) -> (i32, i32) {
    %c0_i32 = arith.constant 0 : i32
    %c0_i32_0 = arith.constant 0 : i32
    return %arg0, %c0_i32 : i32, i32
  }
  func.func @transform_2(%arg0: i32) -> (i32, i32) {
    %c0_i32 = arith.constant 0 : i32
    %c0_i32_0 = arith.constant 0 : i32
    %c0_i32_1 = arith.constant 0 : i32
    return %c0_i32, %c0_i32_0 : i32, i32
  }
  func.func @transform_3(%arg0: i32) -> (i32, i32) {
    %c0_i32 = arith.constant 0 : i32
    %c0_i32_0 = arith.constant 0 : i32
    %c0_i32_1 = arith.constant 0 : i32
    return %c0_i32, %c0_i32_0 : i32, i32
  }
  func.func @transform_4(%arg0: i32) -> (i32, i32) {
    %c0_i32 = arith.constant 0 : i32
    %c0_i32_0 = arith.constant 0 : i32
    %c0_i32_1 = arith.constant 0 : i32
    return %c0_i32, %c0_i32_0 : i32, i32
  }
  func.func @transform_5(%arg0: i32) -> (i32, i32) {
    %c0_i32 = arith.constant 0 : i32
    %c0_i32_0 = arith.constant 0 : i32
    %c0_i32_1 = arith.constant 0 : i32
    return %c0_i32, %c0_i32_0 : i32, i32
  }
  func.func @transform_6(%arg0: i32) -> (i32, i32) {
    %c0_i32 = arith.constant 0 : i32
    %c0_i32_0 = arith.constant 0 : i32
    %c0_i32_1 = arith.constant 0 : i32
    return %c0_i32, %c0_i32_0 : i32, i32
  }
  func.func @transform_7(%arg0: i32) -> (i32, i32) {
    %c0_i32 = arith.constant 0 : i32
    %c0_i32_0 = arith.constant 0 : i32
    %c0_i32_1 = arith.constant 0 : i32
    return %c0_i32, %c0_i32_0 : i32, i32
  }
  func.func @transform_8(%arg0: i32) -> (i32, i32) {
    %c0_i32 = arith.constant 0 : i32
    %c0_i32_0 = arith.constant 0 : i32
    return %arg0, %c0_i32 : i32, i32
  }
}

</mosaic_0001>

<bundles_post_ra>
// kernel: tpu_custom_call.1
= control target key start
LH: loop header
LB: loop body
LE: loop exit
PB: predicated region body
PF: predicated region fallthrough
CT: control target
= control target key end

     0   :  { %14 = vsyncpa [#allocation4], 0  ;;  %s2186_s0 = inlined_call_operand.<no memory space> [shape: f32[1], index: 0, kind: input, shape index: {}]   ;;  %s2187_s1 = inlined_call_operand.hbm [shape: f32[8,16], index: 1, kind: input, shape index: {}]   ;;  %s2188_s2 = inlined_call_operand.hbm [shape: bf16[16,512], index: 2, kind: input, shape index: {}]   ;;  %s2189_s3 = inlined_call_operand.hbm [shape: f32[1,512], index: 3, kind: input, shape index: {}]   ;;  %s2190_s4 = inlined_call_operand.hbm [shape: bf16[512,384], index: 4, kind: input, shape index: {}]   ;;  %s2191_s5 = inlined_call_operand.vmem [shape: f32[1,384], index: 5, kind: input, shape index: {}]   ;;  %s2192_s6 = inlined_call_operand.hbm [shape: bf16[384,128], index: 6, kind: input, shape index: {}]   ;;  %s2193_s7 = inlined_call_operand.vmem [shape: f32[1,128], index: 7, kind: input, shape index: {}]   ;;  %s2194_s8 = inlined_call_operand.hbm [shape: f32[8,128], index: 8, kind: output, shape index: {}]  }
   0x1   :  { %15 = vsyncpa [#allocation7], 0 }
   0x2   :  { %16 = vsyncpa [#allocation10], 0  ;;  %s35_s29 = sshll.u32 %s2188_s2, 4  ;;  %s36_s29 = int_to_ptr.hbm [resolvable:$true] %s35_s29 }
   0x3   :  { %17 = vsyncpa [#allocation5], 0  ;;  %s2066_s30 = smov [#allocation6]   ;;  %s59_s12 = sshll.u32 %s2190_s4, 4  ;;  %s60_s12 = int_to_ptr.hbm [resolvable:$true] %s59_s12 }
   0x4   :  { %s37_s9 = sshll.u32 %s2066_s30, 4  ;;  %s2067_s13 = smov 256   ;;  %s38_s9 = int_to_ptr.vmem [resolvable:$true] %s37_s9 }
   0x5   :  { %s2068_s14 = smov 16   ;;  %s2069_s15 = smov [#allocation9]  }
   0x6   :  { %43 = dma.hbm_to_vmem [thread:$0]  %s36_s29, 512, %s38_s9, [#allocation7], %s2067_s13, %s2067_s13, %s2068_s14  }
   0x7   :  { %s61_s16 = sshll.u32 %s2069_s15, 4  ;;  %s2070_s17 = smov 192   ;;  %s62_s16 = int_to_ptr.vmem [resolvable:$true] %s61_s16 }
   0x8   :  { %s2071_s18 = smov 12   ;;  %s25_s20 = sshll.u32 %s2187_s1, 4  ;;  %s26_s20 = int_to_ptr.hbm [resolvable:$true] %s25_s20 }
   0x9   :  { %67 = dma.hbm_to_vmem [thread:$0]  %s60_s12, 12288, %s62_s16, [#allocation10], %s2070_s17, %s2070_s17, %s2071_s18  }
   0xa   :  { %s2072_s21 = smov [#allocation3]   ;;  %s49_s24 = sshll.u32 %s2189_s3, 4  ;;  %s50_s24 = int_to_ptr.hbm [resolvable:$true] %s49_s24 }
   0xb   :  { %s27_s22 = sshll.u32 %s2072_s21, 4  ;;  %s2073_s25 = smov [#allocation8]   ;;  %s28_s22 = int_to_ptr.vmem [resolvable:$true] %s27_s22 }
   0xc   :  { %30 = dma.hbm_to_vmem [thread:$0]  %s26_s20, 128, %s28_s22, [#allocation4]  }
   0xd   :  { %s51_s26 = sshll.u32 %s2073_s25, 4  ;;  %s74_s29 = sshll.u32 %s2192_s6, 4  ;;  %s52_s26 = int_to_ptr.vmem [resolvable:$true] %s51_s26  ;;  %s75_s29 = int_to_ptr.hbm [resolvable:$true] %s74_s29 }
   0xe   :  { %54 = dma.hbm_to_vmem [thread:$0]  %s50_s24, 64, %s52_s26, [#allocation7]  }
   0xf   :  { %s2074_s1 = smov [#allocation11]   ;;  %s2075_s9 = smov 64  }
  0x10   :  { %s76_s30 = sshll.u32 %s2074_s1, 4  ;;  %s2076_s10 = smov 4   ;;  %s77_s30 = int_to_ptr.vmem [resolvable:$true] %s76_s30 }
  0x11   :  { %82 = dma.hbm_to_vmem [thread:$0]  %s75_s29, 3072, %s77_s30, [#allocation10], %s2075_s9, %s2075_s9, %s2076_s10  }
  0x12   :  { %2058 = dma.done.wait [#allocation4], 128  }
  0x13   :  { %2059 = vsyncadd [#allocation4], 4294967168 }
  0x14   :  { %2060 = dma.done.wait [#allocation7], 576  }
  0x15   :  { %2061 = vsyncadd [#allocation7], 4294966720 }
  0x16   :  { %2062 = dma.done.wait [#allocation10], 15360  }
  0x17   :  { %2063 = vsyncadd [#allocation10], 4294951936  ;;  %v1277_v0 = vld [vmem:[#allocation6] sm:$0xf]  ;;  %v1777_v1 = vld [vmem:[#allocation6 + $0xc] sm:$0xf0] }
  0x18   :  { %v1775_v2 = vld [vmem:[#allocation6 + $0x4] sm:$0xf]  ;;  %v1278_v3 = vor.u32 %v1777_v1, %v1277_v0  ;;  %v1279_v4 = vld [vmem:[#allocation6 + $0x10] sm:$0xf0]  ;;  %v1285_v5 = vld [vmem:[#allocation6 + $0x8] sm:$0xf] }
  0x19   :  { %v1778_v6 = vld [vmem:[#allocation6 + $0x14] sm:$0xf0]  ;;  %v1282_v7 = vor.u32 %v1775_v2, %v1279_v4  ;;  %vm142_vm0 = vcmask 130048   ;;  %v1776_v10 = vld [vmem:[#allocation6 + $0xc] sm:$0xf]  ;;  %s2077_s14 = smov [#allocation12]  }
  0x1a   :  { %v1286_v8 = vor.u32 %v1778_v6, %v1285_v5  ;;  %v106_v9 = vld [vmem:[#allocation3] sm:$0xff]  ;;  %153 = vmatpush.bf16.msra.mxu3 %v1278_v3  ;;  %v1477_v14 = vld [vmem:[#allocation9 + $0x168] sm:$0xf]  ;;  %v1465_v16 = vld [vmem:[#allocation9 + $0x150] sm:$0xf]  ;;  %s1261_s15 = sshll.u32 %s2077_s14, 4  ;;  %s1262_s15 = int_to_ptr.vmem [resolvable:$true] %s1261_s15 }
  0x1b   :  { %v1287_v11 = vld [vmem:[#allocation6 + $0x18] sm:$0xf0]  ;;  %v2138_v12 = vpack.c.bf16 %v106_v9, %v106_v9  ;;  %v1825_v15 = vld [vmem:[#allocation9 + $0x170] sm:$0xf0]  ;;  %166 = vmatpush.bf16.msra.mxu1 %v1282_v7  ;;  %v1822_v18 = vld [vmem:[#allocation9 + $0x158] sm:$0xf0] }
  0x1c   :  { %v1290_v13 = vor.u32 %v1776_v10, %v1287_v11  ;;  %179 = vmatpush.bf16.msra.mxu2 %v1286_v8  ;;  %v1478_v17 = vor.u32 %v1825_v15, %v1477_v14  ;;  %v1381_v19 = vld [vmem:[#allocation9 + $0xa8] sm:$0xf]  ;;  %v1801_v20 = vld [vmem:[#allocation9 + $0xb0] sm:$0xf0]  ;;  %v1466_v24 = vor.u32 %v1822_v18, %v1465_v16  ;;  %v1453_v26 = vld [vmem:[#allocation9 + $0x138] sm:$0xf] }
  0x1d   :  { %v1382_v21 = vor.u32 %v1801_v20, %v1381_v19  ;;  %v1573_v22 = vld [vmem:[#allocation9 + $0x228] sm:$0xf]  ;;  %v1849_v23 = vld [vmem:[#allocation9 + $0x230] sm:$0xf0]  ;;  %1291 = vmatmul.msk.bf16.vlgmr.msra.gmra.mxu3 %vm142_vm0, %v2138_v12  ;;  %v1369_v27 = vld [vmem:[#allocation9 + $0x90] sm:$0xf] }
  0x1e   :  { %192 = vmatpush.bf16.msrb.mxu3 %v1290_v13  ;;  %v1574_v25 = vor.u32 %v1849_v23, %v1573_v22  ;;  %v1798_v28 = vld [vmem:[#allocation9 + $0x98] sm:$0xf0]  ;;  %1292 = vmatmul.msk.bf16.vlgmr.msra.gmra.mxu1 %vm142_vm0, %v2138_v12  ;;  %v1819_v29 = vld [vmem:[#allocation9 + $0x140] sm:$0xf0]  ;;  %v1561_v30 = vld [vmem:[#allocation9 + $0x210] sm:$0xf] }
  0x1f   :  { %867 = vmatpush.bf16.msrb.mxu1 %v1478_v17  ;;  %1293 = vmatmul.msk.bf16.vlgmr.msra.gmra.mxu2 %vm142_vm0, %v2138_v12  ;;  %v1846_v31 = vld [vmem:[#allocation9 + $0x218] sm:$0xf0]  ;;  %v1370_v32 = vor.u32 %v1798_v28, %v1369_v27  ;;  %v1357_v34 = vld [vmem:[#allocation9 + $0x78] sm:$0xf]  ;;  %v1795_v35 = vld [vmem:[#allocation9 + $0x80] sm:$0xf0]  ;;  %v1454_v38 = vor.u32 %v1819_v29, %v1453_v26 }
  0x20   :  { %854 = vmatpush.bf16.msra.mxu0 %v1382_v21  ;;  %880 = vmatpush.bf16.msrb.mxu2 %v1574_v25  ;;  %v1562_v33 = vor.u32 %v1846_v31, %v1561_v30  ;;  %v1549_v36 = vld [vmem:[#allocation9 + $0x1f8] sm:$0xf]  ;;  %v1843_v37 = vld [vmem:[#allocation9 + $0x200] sm:$0xf0]  ;;  %v1441_v39 = vld [vmem:[#allocation9 + $0x120] sm:$0xf]  ;;  %v1358_v41 = vor.u32 %v1795_v35, %v1357_v34 }
  0x21   :  { %v1816_v40 = vld [vmem:[#allocation9 + $0x128] sm:$0xf0]  ;;  %v1550_v42 = vor.u32 %v1843_v37, %v1549_v36  ;;  %v1345_v43 = vld [vmem:[#allocation9 + $0x60] sm:$0xf]  ;;  %v1669_v47 = vld [vmem:[#allocation9 + $0x2e8] sm:$0xf] }
  0x22   :  { %v1792_v44 = vld [vmem:[#allocation9 + $0x68] sm:$0xf0]  ;;  %v1537_v45 = vld [vmem:[#allocation9 + $0x1e0] sm:$0xf]  ;;  %v1442_v48 = vor.u32 %v1816_v40, %v1441_v39  ;;  %v1873_v49 = vld [vmem:[#allocation9 + $0x2f0] sm:$0xf0] }
  0x23   :  { %868 = vmatpush.bf16.msrb.mxu1 %v1466_v24  ;;  %v1840_v46 = vld [vmem:[#allocation9 + $0x1e8] sm:$0xf0]  ;;  %v1429_v50 = vld [vmem:[#allocation9 + $0x108] sm:$0xf]  ;;  %v1813_v51 = vld [vmem:[#allocation9 + $0x110] sm:$0xf0]  ;;  %v1670_v52 = vor.u32 %v1873_v49, %v1669_v47  ;;  %v1346_v53 = vor.u32 %v1792_v44, %v1345_v43 }
  0x24   :  { %855 = vmatpush.bf16.msra.mxu0 %v1370_v32  ;;  %881 = vmatpush.bf16.msrb.mxu2 %v1562_v33  ;;  %v1538_v54 = vor.u32 %v1840_v46, %v1537_v45  ;;  %v1333_v55 = vld [vmem:[#allocation9 + $0x48] sm:$0xf]  ;;  %v1657_v56 = vld [vmem:[#allocation9 + $0x2d0] sm:$0xf]  ;;  %v1870_v57 = vld [vmem:[#allocation9 + $0x2d8] sm:$0xf0]  ;;  %v1430_v62 = vor.u32 %v1813_v51, %v1429_v50 }
  0x25   :  { %v1789_v58 = vld [vmem:[#allocation9 + $0x50] sm:$0xf0]  ;;  %v1525_v59 = vld [vmem:[#allocation9 + $0x1c8] sm:$0xf]  ;;  %893 = vmatpush.bf16.msra.mxu3 %v1670_v52  ;;  %v1658_v61 = vor.u32 %v1870_v57, %v1657_v56  ;;  %v1417_v63 = vld [vmem:[#allocation9 + $0xf0] sm:$0xf] }
  0x26   :  { %v1837_v60 = vld [vmem:[#allocation9 + $0x1d0] sm:$0xf0]  ;;  %v1810_v0 = vld [vmem:[#allocation9 + $0xf8] sm:$0xf0]  ;;  %v1645_v1 = vld [vmem:[#allocation9 + $0x2b8] sm:$0xf]  ;;  %v1334_v2 = vor.u32 %v1789_v58, %v1333_v55 }
  0x27   :  { %869 = vmatpush.bf16.msrb.mxu1 %v1454_v38  ;;  %v1526_v3 = vor.u32 %v1837_v60, %v1525_v59  ;;  %v1321_v4 = vld [vmem:[#allocation9 + $0x30] sm:$0xf]  ;;  %v1867_v5 = vld [vmem:[#allocation9 + $0x2c0] sm:$0xf0]  ;;  %v1786_v6 = vld [vmem:[#allocation9 + $0x38] sm:$0xf0]  ;;  %v1418_v10 = vor.u32 %v1810_v0, %v1417_v63 }
  0x28   :  { %856 = vmatpush.bf16.msra.mxu0 %v1358_v41  ;;  %882 = vmatpush.bf16.msrb.mxu2 %v1550_v42  ;;  %v1513_v7 = vld [vmem:[#allocation9 + $0x1b0] sm:$0xf]  ;;  %v1834_v8 = vld [vmem:[#allocation9 + $0x1b8] sm:$0xf0]  ;;  %v1646_v9 = vor.u32 %v1867_v5, %v1645_v1  ;;  %v1633_v11 = vld [vmem:[#allocation9 + $0x2a0] sm:$0xf]  ;;  %v1322_v16 = vor.u32 %v1786_v6, %v1321_v4 }
  0x29   :  { %894 = vmatpush.bf16.msra.mxu3 %v1658_v61  ;;  %v1864_v13 = vld [vmem:[#allocation9 + $0x2a8] sm:$0xf0]  ;;  %v1405_v14 = vld [vmem:[#allocation9 + $0xd8] sm:$0xf]  ;;  %v1807_v15 = vld [vmem:[#allocation9 + $0xe0] sm:$0xf0]  ;;  %v1514_v17 = vor.u32 %v1834_v8, %v1513_v7 }
  0x2a   :  { %v1309_v18 = vld [vmem:[#allocation9 + $0x18] sm:$0xf]  ;;  %v1783_v19 = vld [vmem:[#allocation9 + $0x20] sm:$0xf0]  ;;  %v1634_v22 = vor.u32 %v1864_v13, %v1633_v11  ;;  %v1406_v23 = vor.u32 %v1807_v15, %v1405_v14  ;;  %v1621_v24 = vld [vmem:[#allocation9 + $0x288] sm:$0xf] }
  0x2b   :  { %870 = vmatpush.bf16.msrb.mxu1 %v1442_v48  ;;  %v1501_v20 = vld [vmem:[#allocation9 + $0x198] sm:$0xf]  ;;  %v1831_v21 = vld [vmem:[#allocation9 + $0x1a0] sm:$0xf0]  ;;  %v1393_v25 = vld [vmem:[#allocation9 + $0xc0] sm:$0xf]  ;;  %v1310_v29 = vor.u32 %v1783_v19, %v1309_v18 }
  0x2c   :  { %857 = vmatpush.bf16.msra.mxu0 %v1346_v53  ;;  %883 = vmatpush.bf16.msrb.mxu2 %v1538_v54  ;;  %v1804_v26 = vld [vmem:[#allocation9 + $0xc8] sm:$0xf0]  ;;  %v1479_v28 = vld [vmem:[#allocation9 + $0x174] sm:$0xf0]  ;;  %v1502_v30 = vor.u32 %v1831_v21, %v1501_v20  ;;  %v1297_v31 = vld [vmem:[#allocation9] sm:$0xf] }
  0x2d   :  { %1294 = vmatmul.msk.bf16.vlgmr.msrb.gmra.mxu3 %vm142_vm0, %v2138_v12  ;;  %v1861_v12 = vld [vmem:[#allocation9 + $0x290] sm:$0xf0]  ;;  %v1824_v27 = vld [vmem:[#allocation9 + $0x16c] sm:$0xf]  ;;  %v1489_v33 = vld [vmem:[#allocation9 + $0x180] sm:$0xf]  ;;  %v1394_v37 = vor.u32 %v1804_v26, %v1393_v25 }
  0x2e   :  { %895 = vmatpush.bf16.msra.mxu3 %v1646_v9  ;;  %v1780_v32 = vld [vmem:[#allocation9 + $0x8] sm:$0xf0]  ;;  %v1622_v36 = vor.u32 %v1861_v12, %v1621_v24  ;;  %v1383_v38 = vld [vmem:[#allocation9 + $0xb4] sm:$0xf0]  ;;  %v1482_v41 = vor.u32 %v1824_v27, %v1479_v28  ;;  %v1609_v42 = vld [vmem:[#allocation9 + $0x270] sm:$0xf] }
  0x2f   :  { %871 = vmatpush.bf16.msrb.mxu1 %v1430_v62  ;;  %v1828_v34 = vld [vmem:[#allocation9 + $0x188] sm:$0xf0]  ;;  %v1575_v40 = vld [vmem:[#allocation9 + $0x234] sm:$0xf0]  ;;  %v1858_v43 = vld [vmem:[#allocation9 + $0x278] sm:$0xf0]  ;;  %v1298_v46 = vor.u32 %v1780_v32, %v1297_v31 }
  0x30   :  { %858 = vmatpush.bf16.msra.mxu0 %v1334_v2  ;;  %884 = vmatpush.bf16.msrb.mxu2 %v1526_v3  ;;  %v1800_v35 = vld [vmem:[#allocation9 + $0xac] sm:$0xf]  ;;  %v1821_v44 = vld [vmem:[#allocation9 + $0x154] sm:$0xf]  ;;  %v1467_v45 = vld [vmem:[#allocation9 + $0x15c] sm:$0xf0]  ;;  %v1490_v47 = vor.u32 %v1828_v34, %v1489_v33  ;;  %v1610_v54 = vor.u32 %v1858_v43, %v1609_v42 }
  0x31   :  { %v1848_v39 = vld [vmem:[#allocation9 + $0x22c] sm:$0xf]  ;;  %v1386_v48 = vor.u32 %v1800_v35, %v1383_v38  ;;  %v1797_v50 = vld [vmem:[#allocation9 + $0x94] sm:$0xf]  ;;  %v1371_v51 = vld [vmem:[#allocation9 + $0x9c] sm:$0xf0]  ;;  %v1470_v55 = vor.u32 %v1821_v44, %v1467_v45 }
  0x32   :  { %896 = vmatpush.bf16.msra.mxu3 %v1634_v22  ;;  %v1578_v49 = vor.u32 %v1848_v39, %v1575_v40  ;;  %v1845_v52 = vld [vmem:[#allocation9 + $0x214] sm:$0xf]  ;;  %v1563_v53 = vld [vmem:[#allocation9 + $0x21c] sm:$0xf0]  ;;  %v1597_v56 = vld [vmem:[#allocation9 + $0x258] sm:$0xf]  ;;  %v1374_v60 = vor.u32 %v1797_v50, %v1371_v51 }
  0x33   :  { %872 = vmatpush.bf16.msrb.mxu1 %v1418_v10  ;;  %v1855_v57 = vld [vmem:[#allocation9 + $0x260] sm:$0xf0]  ;;  %v1818_v58 = vld [vmem:[#allocation9 + $0x13c] sm:$0xf]  ;;  %v1455_v59 = vld [vmem:[#allocation9 + $0x144] sm:$0xf0]  ;;  %v1566_v61 = vor.u32 %v1845_v52, %v1563_v53 }
  0x34   :  { %859 = vmatpush.bf16.msra.mxu0 %v1322_v16  ;;  %885 = vmatpush.bf16.msrb.mxu2 %v1514_v17  ;;  %v1794_v62 = vld [vmem:[#allocation9 + $0x7c] sm:$0xf]  ;;  %v1359_v63 = vld [vmem:[#allocation9 + $0x84] sm:$0xf0]  ;;  %v1598_v2 = vor.u32 %v1855_v57, %v1597_v56  ;;  %v1458_v3 = vor.u32 %v1818_v58, %v1455_v59  ;;  %v1815_v4 = vld [vmem:[#allocation9 + $0x124] sm:$0xf] }
  0x35   :  { %v1842_v0 = vld [vmem:[#allocation9 + $0x1fc] sm:$0xf]  ;;  %v1551_v1 = vld [vmem:[#allocation9 + $0x204] sm:$0xf0]  ;;  %v1443_v5 = vld [vmem:[#allocation9 + $0x12c] sm:$0xf0]  ;;  %v1362_v6 = vor.u32 %v1794_v62, %v1359_v63 }
  0x36   :  { %897 = vmatpush.bf16.msra.mxu3 %v1622_v36  ;;  %v1554_v7 = vor.u32 %v1842_v0, %v1551_v1  ;;  %v1791_v8 = vld [vmem:[#allocation9 + $0x64] sm:$0xf]  ;;  %v1347_v9 = vld [vmem:[#allocation9 + $0x6c] sm:$0xf0]  ;;  %v1446_v13 = vor.u32 %v1815_v4, %v1443_v5  ;;  %v1812_v14 = vld [vmem:[#allocation9 + $0x10c] sm:$0xf] }
  0x37   :  { %873 = vmatpush.bf16.msrb.mxu1 %v1406_v23  ;;  %v1839_v10 = vld [vmem:[#allocation9 + $0x1e4] sm:$0xf]  ;;  %v1539_v11 = vld [vmem:[#allocation9 + $0x1ec] sm:$0xf0]  ;;  %v1431_v15 = vld [vmem:[#allocation9 + $0x114] sm:$0xf0]  ;;  %v1350_v16 = vor.u32 %v1791_v8, %v1347_v9 }
  0x38   :  { %860 = vmatpush.bf16.msra.mxu0 %v1310_v29  ;;  %886 = vmatpush.bf16.msrb.mxu2 %v1502_v30  ;;  %v1542_v17 = vor.u32 %v1839_v10, %v1539_v11  ;;  %v1434_v18 = vor.u32 %v1812_v14, %v1431_v15  ;;  %v1809_v19 = vld [vmem:[#allocation9 + $0xf4] sm:$0xf]  ;;  %v1419_v20 = vld [vmem:[#allocation9 + $0xfc] sm:$0xf0]  ;;  %v1852_v23 = vld [vmem:[#allocation9 + $0x248] sm:$0xf0] }
  0x39   :  { %v1422_v21 = vor.u32 %v1809_v19, %v1419_v20  ;;  %v1585_v22 = vld [vmem:[#allocation9 + $0x240] sm:$0xf]  ;;  %v1788_v12 = vld [vmem:[#allocation9 + $0x4c] sm:$0xf]  ;;  %v1335_v25 = vld [vmem:[#allocation9 + $0x54] sm:$0xf0] }
  0x3a   :  { %898 = vmatpush.bf16.msra.mxu3 %v1610_v54  ;;  %v1586_v24 = vor.u32 %v1852_v23, %v1585_v22  ;;  %v1836_v26 = vld [vmem:[#allocation9 + $0x1cc] sm:$0xf]  ;;  %v1338_v27 = vor.u32 %v1788_v12, %v1335_v25  ;;  %v1527_v28 = vld [vmem:[#allocation9 + $0x1d4] sm:$0xf0]  ;;  %v1806_v33 = vld [vmem:[#allocation9 + $0xdc] sm:$0xf] }
  0x3b   :  { %874 = vmatpush.bf16.msrb.mxu1 %v1394_v37  ;;  %v1872_v29 = vld [vmem:[#allocation9 + $0x2ec] sm:$0xf]  ;;  %v1671_v30 = vld [vmem:[#allocation9 + $0x2f4] sm:$0xf0]  ;;  %v1530_v31 = vor.u32 %v1836_v26, %v1527_v28  ;;  %v1407_v34 = vld [vmem:[#allocation9 + $0xe4] sm:$0xf0] }
  0x3c   :  { %861 = vmatpush.bf16.msra.mxu0 %v1298_v46  ;;  %887 = vmatpush.bf16.msrb.mxu2 %v1490_v47  ;;  %v1674_v32 = vor.u32 %v1872_v29, %v1671_v30  ;;  %v1410_v35 = vor.u32 %v1806_v33, %v1407_v34  ;;  %v1785_v36 = vld [vmem:[#allocation9 + $0x34] sm:$0xf]  ;;  %v1323_v37 = vld [vmem:[#allocation9 + $0x3c] sm:$0xf0]  ;;  %v1803_v45 = vld [vmem:[#allocation9 + $0xc4] sm:$0xf] }
  0x3d   :  { %v1833_v38 = vld [vmem:[#allocation9 + $0x1b4] sm:$0xf]  ;;  %v1326_v39 = vor.u32 %v1785_v36, %v1323_v37  ;;  %v1515_v40 = vld [vmem:[#allocation9 + $0x1bc] sm:$0xf0]  ;;  %v1395_v46 = vld [vmem:[#allocation9 + $0xcc] sm:$0xf0] }
  0x3e   :  { %899 = vmatpush.bf16.msra.mxu3 %v1598_v2  ;;  %v1659_v42 = vld [vmem:[#allocation9 + $0x2dc] sm:$0xf0]  ;;  %v1518_v43 = vor.u32 %v1833_v38, %v1515_v40  ;;  %v1398_v47 = vor.u32 %v1803_v45, %v1395_v46  ;;  %v1830_v50 = vld [vmem:[#allocation9 + $0x19c] sm:$0xf]  ;;  %v1503_v52 = vld [vmem:[#allocation9 + $0x1a4] sm:$0xf0] }
  0x3f   :  { %919 = vmatpush.bf16.msra.mxu1 %v1482_v41  ;;  %v1869_v41 = vld [vmem:[#allocation9 + $0x2d4] sm:$0xf]  ;;  %v1866_v53 = vld [vmem:[#allocation9 + $0x2bc] sm:$0xf]  ;;  %v1647_v54 = vld [vmem:[#allocation9 + $0x2c4] sm:$0xf0] }
  0x40   :  { %906 = vmatpush.bf16.msrb.mxu0 %v1386_v48  ;;  %932 = vmatpush.bf16.msra.mxu2 %v1578_v49  ;;  %v1662_v44 = vor.u32 %v1869_v41, %v1659_v42  ;;  %v1782_v48 = vld [vmem:[#allocation9 + $0x1c] sm:$0xf]  ;;  %v1311_v49 = vld [vmem:[#allocation9 + $0x24] sm:$0xf0]  ;;  %v1650_v56 = vor.u32 %v1866_v53, %v1647_v54  ;;  %v1779_v57 = vld [vmem:[#allocation9 + $0x4] sm:$0xf] }
  0x41   :  { %v1314_v51 = vor.u32 %v1782_v48, %v1311_v49  ;;  %v1299_v58 = vld [vmem:[#allocation9 + $0xc] sm:$0xf0]  ;;  %v1827_v59 = vld [vmem:[#allocation9 + $0x184] sm:$0xf]  ;;  %v1860_v2 = vld [vmem:[#allocation9 + $0x28c] sm:$0xf] }
  0x42   :  { %900 = vmatpush.bf16.msra.mxu3 %v1586_v24  ;;  %v1863_v62 = vld [vmem:[#allocation9 + $0x2a4] sm:$0xf]  ;;  %v1635_v63 = vld [vmem:[#allocation9 + $0x2ac] sm:$0xf0]  ;;  %v1857_v5 = vld [vmem:[#allocation9 + $0x274] sm:$0xf] }
  0x43   :  { %920 = vmatpush.bf16.msra.mxu1 %v1470_v55  ;;  %v1506_v55 = vor.u32 %v1830_v50, %v1503_v52  ;;  %v1638_v1 = vor.u32 %v1863_v62, %v1635_v63  ;;  %v1854_v8 = vld [vmem:[#allocation9 + $0x25c] sm:$0xf]  ;;  %v1599_v9 = vld [vmem:[#allocation9 + $0x264] sm:$0xf0]  ;;  %v1587_v14 = vld [vmem:[#allocation9 + $0x24c] sm:$0xf0] }
  0x44   :  { %907 = vmatpush.bf16.msrb.mxu0 %v1374_v60  ;;  %933 = vmatpush.bf16.msra.mxu2 %v1566_v61  ;;  %v1302_v60 = vor.u32 %v1779_v57, %v1299_v58  ;;  %v1491_v61 = vld [vmem:[#allocation9 + $0x18c] sm:$0xf0]  ;;  %v1602_v10 = vor.u32 %v1854_v8, %v1599_v9  ;;  %v2148_v11 = vld [vmem:[#allocation8] sm:$0xf]  ;;  %v1473_v26 = vld [vmem:[#allocation9 + $0x158] sm:$0xf] }
  0x45   :  { %v1494_v0 = vor.u32 %v1827_v59, %v1491_v61  ;;  %v1485_v19 = vld [vmem:[#allocation9 + $0x170] sm:$0xf]  ;;  %v1826_v20 = vld [vmem:[#allocation9 + $0x178] sm:$0xf0]  ;;  %v116_v23 = vperm.slane %v2148_v11, 2  ;;  %s1263_s18 = sshll.u32 %s2194_s8, 4  ;;  %s1264_s18 = int_to_ptr.hbm [resolvable:$true] %s1263_s18 }
  0x46   :  { %945 = vmatpush.bf16.msrb.mxu3 %v1674_v32  ;;  %v1486_v24 = vor.u32 %v1826_v20, %v1485_v19  ;;  %v1389_v30 = vld [vmem:[#allocation9 + $0xb0] sm:$0xf]  ;;  %v1850_v34 = vld [vmem:[#allocation9 + $0x238] sm:$0xf0]  ;;  %v1461_v40 = vld [vmem:[#allocation9 + $0x140] sm:$0xf] }
  0x47   :  { %921 = vmatpush.bf16.msra.mxu1 %v1458_v3  ;;  %v1623_v3 = vld [vmem:[#allocation9 + $0x294] sm:$0xf0]  ;;  %v1581_v33 = vld [vmem:[#allocation9 + $0x230] sm:$0xf]  ;;  %v1820_v41 = vld [vmem:[#allocation9 + $0x148] sm:$0xf0] }
  0x48   :  { %908 = vmatpush.bf16.msrb.mxu0 %v1362_v6  ;;  %934 = vmatpush.bf16.msra.mxu2 %v1554_v7  ;;  %v1626_v4 = vor.u32 %v1860_v2, %v1623_v3  ;;  %v1611_v6 = vld [vmem:[#allocation9 + $0x27c] sm:$0xf0]  ;;  %v1799_v45 = vld [vmem:[#allocation9 + $0xa0] sm:$0xf0]  ;;  %v1462_v49 = vor.u32 %v1820_v41, %v1461_v40  ;;  %v1449_v52 = vld [vmem:[#allocation9 + $0x128] sm:$0xf] }
  0x49   :  { %v1614_v7 = vor.u32 %v1857_v5, %v1611_v6  ;;  %v1847_v48 = vld [vmem:[#allocation9 + $0x220] sm:$0xf0]  ;;  %v1817_v53 = vld [vmem:[#allocation9 + $0x130] sm:$0xf0]  ;;  %v1796_v57 = vld [vmem:[#allocation9 + $0x88] sm:$0xf0] }
  0x4a   :  { %946 = vmatpush.bf16.msrb.mxu3 %v1662_v44  ;;  %v1377_v44 = vld [vmem:[#allocation9 + $0x98] sm:$0xf]  ;;  %v1557_v58 = vld [vmem:[#allocation9 + $0x200] sm:$0xf]  ;;  %v1844_v59 = vld [vmem:[#allocation9 + $0x208] sm:$0xf0] }
  0x4b   :  { %922 = vmatpush.bf16.msra.mxu1 %v1446_v13  ;;  %v1851_v13 = vld [vmem:[#allocation9 + $0x244] sm:$0xf]  ;;  %v1437_v62 = vld [vmem:[#allocation9 + $0x110] sm:$0xf]  ;;  %v1814_v63 = vld [vmem:[#allocation9 + $0x118] sm:$0xf0] }
  0x4c   :  { %909 = vmatpush.bf16.msrb.mxu0 %v1350_v16  ;;  %935 = vmatpush.bf16.msra.mxu2 %v1542_v17  ;;  %v1590_v15 = vor.u32 %v1851_v13, %v1587_v14  ;;  %v115_v16 = vperm.slane %v2148_v11, 1  ;;  %v1353_v2 = vld [vmem:[#allocation9 + $0x68] sm:$0xf]  ;;  %v1793_v3 = vld [vmem:[#allocation9 + $0x70] sm:$0xf0]  ;;  %v1438_v6 = vor.u32 %v1814_v63, %v1437_v62 }
  0x4d   :  { %v1841_v5 = vld [vmem:[#allocation9 + $0x1f0] sm:$0xf0]  ;;  %v1354_v8 = vor.u32 %v1793_v3, %v1353_v2  ;;  %v1425_v9 = vld [vmem:[#allocation9 + $0xf8] sm:$0xf]  ;;  %v1677_v20 = vld [vmem:[#allocation9 + $0x2f0] sm:$0xf] }
  0x4e   :  { %947 = vmatpush.bf16.msrb.mxu3 %v1650_v56  ;;  %v1365_v56 = vld [vmem:[#allocation9 + $0x80] sm:$0xf]  ;;  %v1629_v62 = vld [vmem:[#allocation9 + $0x290] sm:$0xf]  ;;  %v1862_v63 = vld [vmem:[#allocation9 + $0x298] sm:$0xf0] }
  0x4f   :  { %923 = vmatpush.bf16.msra.mxu1 %v1434_v18  ;;  %v1366_v61 = vor.u32 %v1796_v57, %v1365_v56  ;;  %v1317_v40 = vld [vmem:[#allocation9 + $0x20] sm:$0xf]  ;;  %v1829_v56 = vld [vmem:[#allocation9 + $0x190] sm:$0xf0]  ;;  %v1641_v57 = vld [vmem:[#allocation9 + $0x2a8] sm:$0xf] }
  0x50   :  { %910 = vmatpush.bf16.msrb.mxu0 %v1338_v27  ;;  %936 = vmatpush.bf16.msra.mxu2 %v1530_v31  ;;  %v1823_v27 = vld [vmem:[#allocation9 + $0x160] sm:$0xf0]  ;;  %v1802_v31 = vld [vmem:[#allocation9 + $0xb8] sm:$0xf0] }
  0x51   :  { %v1474_v36 = vor.u32 %v1823_v27, %v1473_v26  ;;  %v1329_v27 = vld [vmem:[#allocation9 + $0x38] sm:$0xf]  ;;  %v1859_v2 = vld [vmem:[#allocation9 + $0x280] sm:$0xf0] }
  0x52   :  { %948 = vmatpush.bf16.msrb.mxu3 %v1638_v1  ;;  %v1558_v1 = vor.u32 %v1844_v59, %v1557_v58  ;;  %v1865_v58 = vld [vmem:[#allocation9 + $0x2b0] sm:$0xf0] }
  0x53   :  { %924 = vmatpush.bf16.msra.mxu1 %v1422_v21  ;;  %v114_v21 = vperm.slane %v2148_v11, 0 }
  0x54   :  { %911 = vmatpush.bf16.msrb.mxu0 %v1326_v39  ;;  %937 = vmatpush.bf16.msra.mxu2 %v1518_v43  ;;  %v1390_v39 = vor.u32 %v1802_v31, %v1389_v30  ;;  %v1582_v43 = vor.u32 %v1850_v34, %v1581_v33  ;;  %v1521_v30 = vld [vmem:[#allocation9 + $0x1b8] sm:$0xf]  ;;  %v1835_v31 = vld [vmem:[#allocation9 + $0x1c0] sm:$0xf0] }
  0x55   :  { %v1665_v33 = vld [vmem:[#allocation9 + $0x2d8] sm:$0xf]  ;;  %v1871_v34 = vld [vmem:[#allocation9 + $0x2e0] sm:$0xf0] }
  0x56   :  { %949 = vmatpush.bf16.msrb.mxu3 %v1626_v4  ;;  %v1545_v4 = vld [vmem:[#allocation9 + $0x1e8] sm:$0xf]  ;;  %v1666_v41 = vor.u32 %v1871_v34, %v1665_v33  ;;  %v1895_v33 = vld [vmem:[#allocation11 + $0xa0] sm:$0xff] }
  0x57   :  { %925 = vmatpush.bf16.msra.mxu1 %v1410_v35  ;;  %v1546_v14 = vor.u32 %v1841_v5, %v1545_v4  ;;  %v1605_v4 = vld [vmem:[#allocation9 + $0x260] sm:$0xf]  ;;  %v1856_v5 = vld [vmem:[#allocation9 + $0x268] sm:$0xf0] }
  0x58   :  { %912 = vmatpush.bf16.msrb.mxu0 %v1314_v51  ;;  %938 = vmatpush.bf16.msra.mxu2 %v1506_v55  ;;  %v1378_v51 = vor.u32 %v1799_v45, %v1377_v44  ;;  %v1509_v44 = vld [vmem:[#allocation9 + $0x1a0] sm:$0xf]  ;;  %v1832_v45 = vld [vmem:[#allocation9 + $0x1a8] sm:$0xf0] }
  0x5a   :  { %950 = vmatpush.bf16.msrb.mxu3 %v1614_v7 }
  0x5b   :  { %926 = vmatpush.bf16.msra.mxu1 %v1398_v47  ;;  %v1569_v47 = vld [vmem:[#allocation9 + $0x218] sm:$0xf] }
  0x5c   :  { %913 = vmatpush.bf16.msrb.mxu0 %v1302_v60  ;;  %939 = vmatpush.bf16.msra.mxu2 %v1494_v0  ;;  %v1570_v54 = vor.u32 %v1847_v48, %v1569_v47  ;;  %v1450_v60 = vor.u32 %v1817_v53, %v1449_v52  ;;  %v117_v0 = vperm.slane %v2148_v11, 3  ;;  %v1533_v11 = vld [vmem:[#allocation9 + $0x1d0] sm:$0xf]  ;;  %v1653_v48 = vld [vmem:[#allocation9 + $0x2c0] sm:$0xf] }
  0x5d   :  { %v1305_v52 = vld [vmem:[#allocation9 + $0x8] sm:$0xf] }
  0x5e   :  { %951 = vmatpush.bf16.msrb.mxu3 %v1602_v10  ;;  %v1811_v10 = vld [vmem:[#allocation9 + $0x100] sm:$0xf0] }
  0x5f   :  { %v1426_v19 = vor.u32 %v1811_v10, %v1425_v9  ;;  %v1882_v9 = vld [vmem:[#allocation11 + $0x38] sm:$0xff]  ;;  %v1881_v10 = vld [vmem:[#allocation11 + $0x30] sm:$0xff] }
  0x62   :  { %952 = vmatpush.bf16.msrb.mxu3 %v1590_v15  ;;  %v1341_v15 = vld [vmem:[#allocation9 + $0x50] sm:$0xf] }
  0x9b   :  { %v168_v17 = vpop.f32.mrf.mxu1 }
  0x9c   :  { %v169_v18 = vadd.f32 %v168_v17, %v115_v16  ;;  %v1790_v16 = vld [vmem:[#allocation9 + $0x58] sm:$0xf0] }
  0x9d   :  { %v1838_v17 = vld [vmem:[#allocation9 + $0x1d8] sm:$0xf0] }
  0x9e   :  { %v199_v22 = vmax.f32 %v169_v18, 0.0  ;;  %v1534_v26 = vor.u32 %v1838_v17, %v1533_v11  ;;  %v1876_v11 = vld [vmem:[#allocation11 + $0x8] sm:$0xff] }
  0x9f   :  { %v1888_v17 = vld [vmem:[#allocation11 + $0x68] sm:$0xff] }
  0xa0   :  { %v2153_v12 = vpack.c.bf16 %v199_v22, %v199_v22  ;;  %v155_v25 = vpop.f32.mrf.mxu3  ;;  %v1413_v22 = vld [vmem:[#allocation9 + $0xe0] sm:$0xf] }
  0xa1   :  { %v156_v28 = vadd.f32 %v155_v25, %v114_v21  ;;  %v1874_v21 = vld [vmem:[#allocation9 + $0x2f8] sm:$0xf0]  ;;  %v1342_v25 = vor.u32 %v1790_v16, %v1341_v15  ;;  %v1877_v15 = vld [vmem:[#allocation11 + $0x10] sm:$0xff] }
  0xa2   :  { %v181_v29 = vpop.f32.mrf.mxu2  ;;  %875 = vmatmul.bf16.vlgmr.msrb.gmra.mxu1 %v2153_v12  ;;  %v1889_v16 = vld [vmem:[#allocation11 + $0x70] sm:$0xff] }
  0xa3   :  { %v182_v32 = vadd.f32 %v181_v29, %v116_v23  ;;  %v198_v35 = vmax.f32 %v156_v28, 0.0  ;;  %971 = vmatpush.bf16.msrb.mxu1 %v1486_v24  ;;  %v170_v37 = vpop.f32.mrf.mxu1  ;;  %v1808_v23 = vld [vmem:[#allocation9 + $0xe8] sm:$0xf0]  ;;  %v1678_v28 = vor.u32 %v1874_v21, %v1677_v20  ;;  %v1787_v29 = vld [vmem:[#allocation9 + $0x40] sm:$0xf0]  ;;  %v1886_v21 = vld [vmem:[#allocation11 + $0x58] sm:$0xff] }
  0xa4   :  { %v1805_v37 = vld [vmem:[#allocation9 + $0xd0] sm:$0xf0] }
  0xa5   :  { %v200_v38 = vmax.f32 %v182_v32, 0.0  ;;  %v2156_v42 = vpack.c.bf16 %v198_v35, %v198_v35  ;;  %v1414_v32 = vor.u32 %v1808_v23, %v1413_v22  ;;  %v1898_v22 = vld [vmem:[#allocation11 + $0xb8] sm:$0xff] }
  0xa7   :  { %v2158_v46 = vpack.c.bf16 %v200_v38, %v200_v38  ;;  %972 = vmatpush.bf16.msrb.mxu1 %v1474_v36  ;;  %862 = vmatmul.bf16.vlgmr.msra.gmra.mxu0 %v2156_v42  ;;  %v1401_v36 = vld [vmem:[#allocation9 + $0xc8] sm:$0xf]  ;;  %v1330_v38 = vor.u32 %v1787_v29, %v1329_v27 }
  0xa8   :  { %v157_v50 = vpop.f32.mrf.mxu3  ;;  %958 = vmatpush.bf16.msra.mxu0 %v1390_v39  ;;  %v1522_v39 = vor.u32 %v1835_v31, %v1521_v30  ;;  %v1402_v47 = vor.u32 %v1805_v37, %v1401_v36  ;;  %v1884_v27 = vld [vmem:[#allocation11 + $0x48] sm:$0xff]  ;;  %v334_v30 = vld [vmem:[%s2191_s5] sm:$0x7]  ;;  %v1894_v36 = vld [vmem:[#allocation11 + $0x98] sm:$0xff] }
  0xa9   :  { %888 = vmatmul.bf16.vlgmr.msrb.gmra.mxu2 %v2158_v46  ;;  %v336_v34 = vperm.slane %v334_v30, 0 }
  0xaa   :  { %984 = vmatpush.bf16.msrb.mxu2 %v1582_v43  ;;  %v183_v55 = vpop.f32.mrf.mxu2  ;;  %v1784_v43 = vld [vmem:[#allocation9 + $0x28] sm:$0xf0] }
  0xab   :  { %973 = vmatpush.bf16.msrb.mxu1 %v1462_v49  ;;  %v1868_v49 = vld [vmem:[#allocation9 + $0x2c8] sm:$0xf0]  ;;  %v1318_v50 = vor.u32 %v1784_v43, %v1317_v40  ;;  %v1497_v55 = vld [vmem:[#allocation9 + $0x188] sm:$0xf] }
  0xac   :  { %959 = vmatpush.bf16.msra.mxu0 %v1378_v51  ;;  %v1510_v51 = vor.u32 %v1832_v45, %v1509_v44  ;;  %v1654_v53 = vor.u32 %v1868_v49, %v1653_v48 }
  0xae   :  { %985 = vmatpush.bf16.msrb.mxu2 %v1570_v54  ;;  %v1781_v54 = vld [vmem:[#allocation9 + $0x10] sm:$0xf0] }
  0xaf   :  { %974 = vmatpush.bf16.msrb.mxu1 %v1450_v60  ;;  %v1306_v59 = vor.u32 %v1781_v54, %v1305_v52  ;;  %v1498_v60 = vor.u32 %v1829_v56, %v1497_v55  ;;  %v1891_v52 = vld [vmem:[#allocation11 + $0x80] sm:$0xff] }
  0xb0   :  { %v194_v7 = vpop.f32.mrf.mxu3  ;;  %960 = vmatpush.bf16.msra.mxu0 %v1366_v61  ;;  %v1642_v61 = vor.u32 %v1865_v58, %v1641_v57 }
  0xb1   :  { %v195_v13 = vadd.f32 %v194_v7, %v117_v0  ;;  %v1630_v0 = vor.u32 %v1862_v63, %v1629_v62  ;;  %v1853_v7 = vld [vmem:[#allocation9 + $0x250] sm:$0xf0] }
  0xb2   :  { %986 = vmatpush.bf16.msrb.mxu2 %v1558_v1  ;;  %927 = vmatmul.bf16.vlgmr.msra.gmra.mxu1 %v2153_v12  ;;  %v1617_v1 = vld [vmem:[#allocation9 + $0x278] sm:$0xf] }
  0xb3   :  { %v201_v18 = vmax.f32 %v195_v13, 0.0  ;;  %975 = vmatpush.bf16.msrb.mxu1 %v1438_v6  ;;  %v1618_v3 = vor.u32 %v1859_v2, %v1617_v1  ;;  %v1593_v6 = vld [vmem:[#allocation9 + $0x248] sm:$0xf]  ;;  %v1878_v13 = vld [vmem:[#allocation11 + $0x18] sm:$0xff] }
  0xb4   :  { %961 = vmatpush.bf16.msra.mxu0 %v1354_v8  ;;  %v1594_v8 = vor.u32 %v1853_v7, %v1593_v6 }
  0xb5   :  { %v2164_v24 = vpack.c.bf16 %v201_v18, %v201_v18  ;;  %v1875_v18 = vld [vmem:[#allocation11] sm:$0xff] }
  0xb6   :  { %987 = vmatpush.bf16.msrb.mxu2 %v1546_v14  ;;  %v1890_v14 = vld [vmem:[#allocation11 + $0x78] sm:$0xff] }
  0xb7   :  { %976 = vmatpush.bf16.msrb.mxu1 %v1426_v19  ;;  %901 = vmatmul.bf16.vlgmr.msra.gmra.mxu3 %v2164_v24  ;;  %v1887_v19 = vld [vmem:[#allocation11 + $0x60] sm:$0xff] }
  0xb8   :  { %914 = vmatmul.bf16.vlgmr.msrb.gmra.mxu0 %v2156_v42  ;;  %v196_v35 = vpop.f32.mrf.mxu3  ;;  %997 = vmatpush.bf16.msra.mxu3 %v1678_v28  ;;  %v1896_v28 = vld [vmem:[#allocation11 + $0xa8] sm:$0xff] }
  0xb9   :  { %940 = vmatmul.bf16.vlgmr.msra.gmra.mxu2 %v2158_v46  ;;  %962 = vmatpush.bf16.msra.mxu0 %v1342_v25  ;;  %v1897_v25 = vld [vmem:[#allocation11 + $0xb0] sm:$0xff] }
  0xba   :  { %988 = vmatpush.bf16.msrb.mxu2 %v1534_v26 }
  0xbb   :  { %977 = vmatpush.bf16.msrb.mxu1 %v1414_v32  ;;  %v1883_v32 = vld [vmem:[#allocation11 + $0x40] sm:$0xff] }
  0xbc   :  { %998 = vmatpush.bf16.msra.mxu3 %v1666_v41 }
  0xbd   :  { %963 = vmatpush.bf16.msra.mxu0 %v1330_v38 }
  0xbe   :  { %989 = vmatpush.bf16.msrb.mxu2 %v1522_v39  ;;  %v1893_v39 = vld [vmem:[#allocation11 + $0x90] sm:$0xff] }
  0xbf   :  { %978 = vmatpush.bf16.msrb.mxu1 %v1402_v47  ;;  %v1892_v47 = vld [vmem:[#allocation11 + $0x88] sm:$0xff] }
  0xc0   :  { %999 = vmatpush.bf16.msra.mxu3 %v1654_v53  ;;  %v337_v53 = vperm.slane %v334_v30, 1 }
  0xc1   :  { %964 = vmatpush.bf16.msra.mxu0 %v1318_v50 }
  0xc2   :  { %990 = vmatpush.bf16.msrb.mxu2 %v1510_v51  ;;  %979 = vmatmul.bf16.vlgmr.msrb.gmra.mxu1 %v2153_v12  ;;  %v1606_v12 = vor.u32 %v1856_v5, %v1605_v4  ;;  %v338_v5 = vperm.slane %v334_v30, 2 }
  0xc3   :  { %1225 = vmatpush.bf16.msra.mxu1 %v1890_v14 }
  0xc4   :  { %1000 = vmatpush.bf16.msra.mxu3 %v1642_v61 }
  0xc5   :  { %965 = vmatpush.bf16.msra.mxu0 %v1306_v59 }
  0xc6   :  { %991 = vmatpush.bf16.msrb.mxu2 %v1498_v60 }
  0xc7   :  { %953 = vmatmul.bf16.vlgmr.msrb.gmra.mxu3 %v2164_v24  ;;  %1226 = vmatpush.bf16.msra.mxu1 %v1889_v16 }
  0xc8   :  { %966 = vmatmul.bf16.vlgmr.msra.gmra.mxu0 %v2156_v42  ;;  %1001 = vmatpush.bf16.msra.mxu3 %v1630_v0  ;;  %v1880_v42 = vld [vmem:[#allocation11 + $0x28] sm:$0xff] }
  0xc9   :  { %992 = vmatmul.bf16.vlgmr.msrb.gmra.mxu2 %v2158_v46  ;;  %1212 = vmatpush.bf16.msrb.mxu0 %v1882_v9  ;;  %v1879_v46 = vld [vmem:[#allocation11 + $0x20] sm:$0xff] }
  0xca   :  { %1238 = vmatpush.bf16.msra.mxu2 %v1898_v22 }
  0xcb   :  { %1227 = vmatpush.bf16.msra.mxu1 %v1888_v17 }
  0xcc   :  { %1002 = vmatpush.bf16.msra.mxu3 %v1618_v3 }
  0xcd   :  { %1213 = vmatpush.bf16.msrb.mxu0 %v1881_v10 }
  0xce   :  { %1239 = vmatpush.bf16.msra.mxu2 %v1897_v25 }
  0xcf   :  { %1228 = vmatpush.bf16.msra.mxu1 %v1887_v19 }
  0xd0   :  { %1003 = vmatpush.bf16.msra.mxu3 %v1606_v12 }
  0xd1   :  { %1214 = vmatpush.bf16.msrb.mxu0 %v1880_v42 }
  0xd2   :  { %1240 = vmatpush.bf16.msra.mxu2 %v1896_v28 }
  0xd3   :  { %1229 = vmatpush.bf16.msra.mxu1 %v1886_v21 }
  0xd4   :  { %1004 = vmatpush.bf16.msra.mxu3 %v1594_v8 }
  0xd5   :  { %1215 = vmatpush.bf16.msrb.mxu0 %v1879_v46 }
  0xd6   :  { %1241 = vmatpush.bf16.msra.mxu2 %v1895_v33 }
  0xd7   :  { %1005 = vmatmul.bf16.vlgmr.msra.gmra.mxu3 %v2164_v24  ;;  %v1885_v24 = vld [vmem:[#allocation11 + $0x50] sm:$0xff] }
  0xd8   :  { %1230 = vmatpush.bf16.msra.mxu1 %v1885_v24 }
  0xd9   :  { %1216 = vmatpush.bf16.msrb.mxu0 %v1878_v13 }
  0xda   :  { %1242 = vmatpush.bf16.msra.mxu2 %v1894_v36 }
  0xdc   :  { %1231 = vmatpush.bf16.msra.mxu1 %v1884_v27 }
  0xdd   :  { %1217 = vmatpush.bf16.msrb.mxu0 %v1877_v15 }
  0xde   :  { %1243 = vmatpush.bf16.msra.mxu2 %v1893_v39 }
  0xe0   :  { %1232 = vmatpush.bf16.msra.mxu1 %v1883_v32 }
  0xe1   :  { %1218 = vmatpush.bf16.msrb.mxu0 %v1876_v11 }
  0xe2   :  { %1244 = vmatpush.bf16.msra.mxu2 %v1892_v47 }
  0xe5   :  { %1219 = vmatpush.bf16.msrb.mxu0 %v1875_v18  ;;  %v1911_v18 = vld [vmem:[%s2193_s7] ss:$0 sm:$0xff] }
  0xe6   :  { %1245 = vmatpush.bf16.msra.mxu2 %v1891_v52 }
 0x11f   :  { %v876_v20 = vpop.f32.mrf.mxu1 }
 0x124   :  { %v863_v23 = vpop.f32.mrf.mxu0 }
 0x125   :  { %v864_v37 = vadd.f32 %v863_v23, %v336_v34  ;;  %v1253_v23 = vstv %s2186_s0 }
 0x127   :  { %v878_v26 = vpop.f32.mrf.mxu1  ;;  %v877_v41 = vadd.f32 %v876_v20, %v864_v37 }
 0x12c   :  { %v889_v29 = vpop.f32.mrf.mxu2  ;;  %v865_v31 = vpop.f32.mrf.mxu0 }
 0x12d   :  { %v890_v44 = vadd.f32 %v889_v29, %v877_v41 }
 0x12f   :  { %v928_v35 = vpop.f32.mrf.mxu1 }
 0x134   :  { %v891_v38 = vpop.f32.mrf.mxu2 }
 0x135   :  { %v915_v40 = vpop.f32.mrf.mxu0 }
 0x136   :  { %v916_v57 = vadd.f32 %v915_v40, %v337_v53 }
 0x137   :  { %v930_v43 = vpop.f32.mrf.mxu1 }
 0x138   :  { %v929_v60 = vadd.f32 %v928_v35, %v916_v57 }
 0x13a   :  { %v902_v45 = vpop.f32.mrf.mxu3 }
 0x13b   :  { %v903_v48 = vadd.f32 %v902_v45, %v890_v44 }
 0x13c   :  { %v941_v49 = vpop.f32.mrf.mxu2 }
 0x13d   :  { %v1010_v50 = vmax.f32 %v903_v48, 0.0  ;;  %v917_v51 = vpop.f32.mrf.mxu0  ;;  %v942_v62 = vadd.f32 %v941_v49, %v929_v60 }
 0x13f   :  { %v1013_v54 = vpack.c.bf16 %v1010_v50, %v1010_v50  ;;  %v980_v55 = vpop.f32.mrf.mxu1 }
 0x141   :  { %1220 = vmatmul.bf16.vlgmr.msrb.gmra.mxu0 %v1013_v54 }
 0x142   :  { %v904_v56 = vpop.f32.mrf.mxu3 }
 0x144   :  { %v943_v58 = vpop.f32.mrf.mxu2 }
 0x145   :  { %v967_v59 = vpop.f32.mrf.mxu0 }
 0x146   :  { %v968_v7 = vadd.f32 %v967_v59, %v338_v5 }
 0x147   :  { %v982_v61 = vpop.f32.mrf.mxu1 }
 0x148   :  { %v981_v8 = vadd.f32 %v980_v55, %v968_v7 }
 0x14a   :  { %v954_v63 = vpop.f32.mrf.mxu3 }
 0x14b   :  { %v955_v0 = vadd.f32 %v954_v63, %v942_v62 }
 0x14c   :  { %v993_v1 = vpop.f32.mrf.mxu2 }
 0x14d   :  { %v1011_v2 = vmax.f32 %v955_v0, 0.0  ;;  %v969_v3 = vpop.f32.mrf.mxu0  ;;  %v994_v9 = vadd.f32 %v993_v1, %v981_v8 }
 0x14f   :  { %v1014_v4 = vpack.c.bf16 %v1011_v2, %v1011_v2 }
 0x151   :  { %1233 = vmatmul.bf16.vlgmr.msra.gmra.mxu1 %v1014_v4 }
 0x152   :  { %v956_v12 = vpop.f32.mrf.mxu3 }
 0x154   :  { %v995_v6 = vpop.f32.mrf.mxu2 }
 0x15a   :  { %v1006_v10 = vpop.f32.mrf.mxu3 }
 0x15b   :  { %v1007_v42 = vadd.f32 %v1006_v10, %v994_v9 }
 0x15d   :  { %v1012_v46 = vmax.f32 %v1007_v42, 0.0 }
 0x15f   :  { %v1015_v13 = vpack.c.bf16 %v1012_v46, %v1012_v46 }
 0x161   :  { %1246 = vmatmul.bf16.vlgmr.msra.gmra.mxu2 %v1015_v13 }
 0x162   :  { %v1008_v14 = vpop.f32.mrf.mxu3 }
 0x1be   :  { %v1221_v15 = vpop.f32.mrf.mxu0 }
 0x1bf   :  { %v1222_v19 = vadd.f32 %v1911_v18, %v1221_v15 }
 0x1c6   :  { %v1223_v16 = vpop.f32.mrf.mxu0 }
 0x1ce   :  { %v1234_v11 = vpop.f32.mrf.mxu1 }
 0x1cf   :  { %v1235_v20 = vadd.f32 %v1234_v11, %v1222_v19 }
 0x1d6   :  { %v1236_v17 = vpop.f32.mrf.mxu1 }
 0x1e4   :  { %v1247_v21 = vpop.f32.mrf.mxu2 }
 0x1e5   :  { %v1248_v22 = vadd.f32 %v1247_v21, %v1235_v20 }
 0x1e7   :  { %1912 = vtanh.f32 %v1248_v22 }
 0x1ec   :  { %v1249_v24 = vpop.f32.mrf.mxu2 }
 0x1ed   :  { %v1913_v25 = vpop.eup %1912 }
 0x1ee   :  { %v1254_v26 = vmul.f32 %v1913_v25, %v1253_v23 }
 0x1f0   :  { %1255 = vst [vmem:[#allocation12] sm:$0xff] %v1254_v26 }
 0x1f1   :  { %1266 = dma.vmem_to_hbm [thread:$0]  %s1262_s15, 128, %s1264_s18, [#allocation5]  }
 0x1f2   :  { %2064 = dma.done.wait [#allocation5], 128  }
 0x1f3   :  { %2065 = vsyncadd [#allocation5], 4294967168 }
 0x1f4   :  { %1271 = vsyncpa [#allocation4], 1 }
 0x1f5   :  { %1272 = vsyncpa [#allocation7], 1 }
 0x1f6   :  { %1273 = vsyncpa [#allocation10], 1 }
 0x1f7   :  { %1274 = vsyncpa [#allocation5], 1 }

</bundles_post_ra>
